<compile_context>
chip_gen: v7x
topology: tpu7x:2x2x1
jax: 0.10.0
libtpu: 0.0.40
codegen_flags: <defaults>
</compile_context>

<pallas_src>
import jax
import jax.numpy as jnp
from jax import lax
from jax.experimental import pallas as pl
from jax.experimental.pallas import tpu as pltpu

NUM_STATES = 4
NUM_ACTIONS = 2
NUM_ATOMS = 50
VMIN, VMAX = -10, 10

LANE = 128                 # vreg lane width; every column group is one lane group
XK = 8                     # padded input feature dim (4 states -> 8 lanes)
W_COLS = 4 * LANE          # packed weight slab columns: [L2 | mid | head_g0 | head_g1]
B_COLS = 5 * LANE          # packed bias slab columns:  [L1 | L2 | mid | head_g0 | head_g1]
C_L2, C_MID, C_HG0, C_HG1 = 0, 128, 256, 384
BC_L1, BC_L2, BC_MID, BC_HG0, BC_HG1 = 0, 128, 256, 384, 512


# ---------------------------------------------------------------------------
# Pallas kernel: full RainbowDQN forward for one batch tile.
# ---------------------------------------------------------------------------
def rainbow_kernel(x_ref, w1_ref, w_ref, b_ref, out_ref):
    f32 = jnp.float32
    x = x_ref[...]                                            # (bb, 8): states in lanes 0:4

    # trunk: Linear(4,32) -> ReLU -> Linear(32,64) -> ReLU    (zero-padded to 128 lanes)
    h1 = jnp.maximum(
        jnp.dot(x, w1_ref[...], preferred_element_type=f32)
        + b_ref[:, BC_L1:BC_L1 + LANE], 0.0)
    h2 = jnp.maximum(
        jnp.dot(h1, w_ref[:, C_L2:C_L2 + LANE], preferred_element_type=f32)
        + b_ref[:, BC_L2:BC_L2 + LANE], 0.0)

    # merged noisy hidden layer: lanes 0:64 = value1, lanes 64:128 = advantage1
    hm = jnp.maximum(
        jnp.dot(h2, w_ref[:, C_MID:C_MID + LANE], preferred_element_type=f32)
        + b_ref[:, BC_MID:BC_MID + LANE], 0.0)

    # merged block-diagonal heads, N=256:
    #   group0: value @ lanes 0:50, advantage(action0) @ lanes 64:114
    #   group1: advantage(action1) @ lanes 0:50
    heads = (jnp.dot(hm, w_ref[:, C_HG0:C_HG1 + LANE], preferred_element_type=f32)
             + b_ref[:, BC_HG0:BC_HG1 + LANE])                # (bb, 256)
    g0 = heads[:, 0:LANE]
    g1 = heads[:, LANE:2 * LANE]

    value = g0                                   # valid in lanes 0:50
    adv0 = pltpu.roll(g0, 64, axis=1)            # adv(action0) moved to lanes 0:50 (XLU, free)
    adv1 = g1                                    # valid in lanes 0:50

    # dueling combine: value + adv - adv.mean(over the 2 actions)
    adv_mean = 0.5 * (adv0 + adv1)
    l0 = value + adv0 - adv_mean
    l1 = value + adv1 - adv_mean

    # softmax over the 50 valid atom lanes (iota mask keeps garbage lanes inert)
    lane = lax.broadcasted_iota(jnp.int32, l0.shape, 1)
    valid = lane < NUM_ATOMS
    neg = jnp.float32(-1e30)

    def _softmax(l):
        lm = jnp.where(valid, l, neg)
        m = jnp.max(lm, axis=-1, keepdims=True)
        e = jnp.where(valid, jnp.exp(lm - m), 0.0)
        s = jnp.sum(e, axis=-1, keepdims=True)
        inv = pl.reciprocal(s, approx=True)      # EUP vrcp (free slot)
        inv = inv * (2.0 - s * inv)              # one Newton step -> ~f32 accuracy
        return e * inv

    p0 = _softmax(l0)                            # exact zeros outside lanes 0:50
    p1 = _softmax(l1)

    # pack both distributions into one 128-lane block:
    #   lanes 0:50 = action 0, lanes 64:114 = action 1; single unmasked 128-wide store
    out_ref[...] = p0 + pltpu.roll(p1, 64, axis=1)


# ---------------------------------------------------------------------------
# Wrapper: near-equal batch tiles, packed / split operands.
# ---------------------------------------------------------------------------
def _round_up(n, m):
    return ((n + m - 1) // m) * m


def rainbow_forward(x, packed, *, block_b=1024):
    """x: (B, num_states) f32 -> (B, num_actions, num_atoms) f32."""
    w1_slab, w_slab, b_slab = packed
    B = x.shape[0]
    B8 = _round_up(B, 8)
    n_steps = max(1, -(-B8 // max(block_b, 8)))
    if B8 >= 16:
        n_steps = max(n_steps, 2)            # >=2 grid steps so both v7x TCs get work
    bb = _round_up(-(-B8 // n_steps), 8)     # near-equal tiles, multiple of 8 (<8 dead rows)
    B_pad = bb * n_steps

    # compact input: only 8 lanes per row (states in lanes 0:4, rest zero)
    x8 = jnp.zeros((B_pad, XK), jnp.float32).at[:B, :NUM_STATES].set(x)

    out = pl.pallas_call(
        rainbow_kernel,
        out_shape=jax.ShapeDtypeStruct((B_pad, LANE), jnp.float32),
        grid=(n_steps,),
        in_specs=[
            pl.BlockSpec((bb, XK), lambda i: (i, 0)),          # x: batch-tiled, compact
            pl.BlockSpec((XK, LANE), lambda i: (0, 0)),        # L1 weight (one native tile)
            pl.BlockSpec((LANE, W_COLS), lambda i: (0, 0)),    # L2/mid/head weights, resident
            pl.BlockSpec((1, B_COLS), lambda i: (0, 0)),       # biases, resident
        ],
        out_specs=pl.BlockSpec((bb, LANE), lambda i: (i, 0)),
        compiler_params=pltpu.CompilerParams(
            dimension_semantics=("parallel",)),
    )(x8, w1_slab, w_slab, b_slab)

    # lanes 0:50 -> action 0, lanes 64:114 -> action 1
    return out[:B].reshape(B, NUM_ACTIONS, LANE // 2)[:, :, :NUM_ATOMS]


# ---------------------------------------------------------------------------
# Deterministic parameter construction + packing (plain-JAX glue).
# ---------------------------------------------------------------------------
def _linear_params(key, fan_in, fan_out):
    """PyTorch nn.Linear default init: U(-1/sqrt(fan_in), 1/sqrt(fan_in))."""
    kw, kb = jax.random.split(key)
    bound = 1.0 / jnp.sqrt(fan_in)
    w = jax.random.uniform(kw, (fan_in, fan_out), jnp.float32, -bound, bound)
    b = jax.random.uniform(kb, (1, fan_out), jnp.float32, -bound, bound)
    return w, b


def _noisy_linear_params(key, fan_in, fan_out, sigma_init=0.017):
    """Effective weights of a factorized NoisyLinear: mu + sigma * eps."""
    kmu_w, kmu_b, kin, kout = jax.random.split(key, 4)
    bound = 1.0 / jnp.sqrt(fan_in)
    w_mu = jax.random.uniform(kmu_w, (fan_in, fan_out), jnp.float32, -bound, bound)
    b_mu = jax.random.uniform(kmu_b, (1, fan_out), jnp.float32, -bound, bound)
    w_sigma = jnp.full((fan_in, fan_out), sigma_init, jnp.float32)
    b_sigma = jnp.full((1, fan_out), sigma_init, jnp.float32)

    def f(e):
        return jnp.sign(e) * jnp.sqrt(jnp.abs(e))

    eps_in = f(jax.random.normal(kin, (fan_in,), jnp.float32))
    eps_out = f(jax.random.normal(kout, (fan_out,), jnp.float32))
    w_eps = jnp.outer(eps_in, eps_out)
    b_eps = eps_out[None, :]
    return w_mu + w_sigma * w_eps, b_mu + b_sigma * b_eps


def make_rainbow_params(key):
    keys = jax.random.split(key, 6)
    w1, b1 = _linear_params(keys[0], NUM_STATES, 32)
    w2, b2 = _linear_params(keys[1], 32, 64)
    wv1, bv1 = _noisy_linear_params(keys[2], 64, 64)
    wv2, bv2 = _noisy_linear_params(keys[3], 64, NUM_ATOMS)
    wa1, ba1 = _noisy_linear_params(keys[4], 64, 64)
    wa2, ba2 = _noisy_linear_params(keys[5], 64, NUM_ATOMS * NUM_ACTIONS)
    return (w1, b1, w2, b2, wv1, bv1, wv2, bv2, wa1, ba1, wa2, ba2)


def pack_params(params):
    """Pack all 12 tensors into a (8,128) L1 tile + (128,512) slab + (1,640) biases."""
    (w1, b1, w2, b2, wv1, bv1, wv2, bv2, wa1, ba1, wa2, ba2) = params
    w1s = jnp.zeros((XK, LANE), jnp.float32).at[:NUM_STATES, :32].set(w1)
    w = jnp.zeros((LANE, W_COLS), jnp.float32)
    b = jnp.zeros((1, B_COLS), jnp.float32)
    # trunk
    b = b.at[:, BC_L1:BC_L1 + 32].set(b1)
    w = w.at[:32, C_L2:C_L2 + 64].set(w2)
    b = b.at[:, BC_L2:BC_L2 + 64].set(b2)
    # merged noisy hidden: lanes 0:64 = value1, lanes 64:128 = advantage1 (input = h2 lanes 0:64)
    w = w.at[:64, C_MID:C_MID + 64].set(wv1)
    w = w.at[:64, C_MID + 64:C_MID + 128].set(wa1)
    b = b.at[:, BC_MID:BC_MID + 64].set(bv1)
    b = b.at[:, BC_MID + 64:BC_MID + 128].set(ba1)
    # head group 0: value (lanes 0:50, from hm lanes 0:64) + adv action0 (lanes 64:114)
    w = w.at[:64, C_HG0:C_HG0 + NUM_ATOMS].set(wv2)
    b = b.at[:, BC_HG0:BC_HG0 + NUM_ATOMS].set(bv2)
    w = w.at[64:128, C_HG0 + 64:C_HG0 + 64 + NUM_ATOMS].set(wa2[:, :NUM_ATOMS])
    b = b.at[:, BC_HG0 + 64:BC_HG0 + 64 + NUM_ATOMS].set(ba2[:, :NUM_ATOMS])
    # head group 1: adv action1 (lanes 0:50, from hm lanes 64:128)
    w = w.at[64:128, C_HG1:C_HG1 + NUM_ATOMS].set(wa2[:, NUM_ATOMS:])
    b = b.at[:, BC_HG1:BC_HG1 + NUM_ATOMS].set(ba2[:, NUM_ATOMS:])
    return w1s, w, b


# ---------------------------------------------------------------------------
# Pure-JAX reference (for a correctness sanity check).
# ---------------------------------------------------------------------------
def rainbow_forward_ref(x, params):
    (w1, b1, w2, b2, wv1, bv1, wv2, bv2, wa1, ba1, wa2, ba2) = params
    h = jax.nn.relu(x @ w1 + b1)
    h = jax.nn.relu(h @ w2 + b2)
    v = jax.nn.relu(h @ wv1 + bv1)
    v = (v @ wv2 + bv2).reshape(-1, 1, NUM_ATOMS)
    a = jax.nn.relu(h @ wa1 + ba1)
    a = (a @ wa2 + ba2).reshape(-1, NUM_ACTIONS, NUM_ATOMS)
    q = v + a - a.mean(axis=1, keepdims=True)
    return jax.nn.softmax(q.reshape(-1, NUM_ATOMS), axis=-1).reshape(
        -1, NUM_ACTIONS, NUM_ATOMS)


if __name__ == "__main__":
    key = jax.random.PRNGKey(0)
    k_params, k_x = jax.random.split(key)

    params = make_rainbow_params(k_params)
    packed = pack_params(params)

    # small batch (single grid step)
    B = 8
    x = jax.random.normal(k_x, (B, NUM_STATES), jnp.float32)
    out = jax.block_until_ready(rainbow_forward(x, packed))
    ref = rainbow_forward_ref(x, params)
    assert out.shape == (B, NUM_ACTIONS, NUM_ATOMS)
    assert jnp.allclose(out, ref, atol=1e-5, rtol=1e-5), "mismatch vs reference (B=8)"
    assert jnp.allclose(out.sum(-1), 1.0, atol=1e-5)

    # larger batch exercising near-equal tiles + the 2-step parallel grid
    B2 = 300
    x2 = jax.random.normal(jax.random.PRNGKey(1), (B2, NUM_STATES), jnp.float32)
    out2 = jax.block_until_ready(rainbow_forward(x2, packed))
    ref2 = rainbow_forward_ref(x2, params)
    assert out2.shape == (B2, NUM_ACTIONS, NUM_ATOMS)
    assert jnp.allclose(out2, ref2, atol=1e-5, rtol=1e-5), "mismatch vs reference (B=300)"
    assert jnp.allclose(out2.sum(-1), 1.0, atol=1e-5)

    print("KERNEL_OK")
</pallas_src>

<mosaic_0001>
module attributes {stable_mosaic.version = 11 : i64} {
  func.func @rainbow_kernel(%arg0: i32, %arg1: memref<8x8xf32, #tpu.memory_space<vmem>>, %arg2: memref<8x128xf32, #tpu.memory_space<vmem>>, %arg3: memref<128x512xf32, #tpu.memory_space<vmem>>, %arg4: memref<1x640xf32, #tpu.memory_space<vmem>>, %arg5: memref<8x128xf32, #tpu.memory_space<vmem>>) attributes {dimension_semantics = [#tpu.dimension_semantics<parallel>], iteration_bounds = array<i64: 1>, scalar_prefetch = 0 : i64, scratch_operands = 0 : i64, tpu.core_type = #tpu.core_type<tc>, window_params = [{transform_indices = @transform_0, window_bounds = array<i64: 8, 8>}, {pipeline_mode = #tpu.pipeline_mode<synchronous>, transform_indices = @transform_1, window_bounds = array<i64: 8, 128>}, {pipeline_mode = #tpu.pipeline_mode<synchronous>, transform_indices = @transform_2, window_bounds = array<i64: 128, 512>}, {pipeline_mode = #tpu.pipeline_mode<synchronous>, transform_indices = @transform_3, window_bounds = array<i64: 1, 640>}, {transform_indices = @transform_4, window_bounds = array<i64: 8, 128>}]} {
    %c0 = arith.constant 0 : index
    %c0_0 = arith.constant 0 : index
    %0 = vector.load %arg1[%c0, %c0_0] : memref<8x8xf32, #tpu.memory_space<vmem>>, vector<8x8xf32>
    %c0_1 = arith.constant 0 : index
    %c0_2 = arith.constant 0 : index
    %1 = vector.load %arg2[%c0_1, %c0_2] : memref<8x128xf32, #tpu.memory_space<vmem>>, vector<8x128xf32>
    %cst = arith.constant dense<0.000000e+00> : vector<8x128xf32>
    %2 = tpu.matmul %0, %1, %cst {dimension_numbers = #tpu.dot_dimension_numbers<[1], [0], [0], [1], [0, 0, 1, 1], [], []>} : vector<8x8xf32>, vector<8x128xf32>, vector<8x128xf32> -> vector<8x128xf32>
    %c0_3 = arith.constant 0 : index
    %c0_4 = arith.constant 0 : index
    %3 = vector.load %arg4[%c0_3, %c0_4] : memref<1x640xf32, #tpu.memory_space<vmem>>, vector<1x128xf32>
    %4 = vector.broadcast %3 : vector<1x128xf32> to vector<8x128xf32>
    %5 = arith.addf %2, %4 : vector<8x128xf32>
    %cst_5 = arith.constant 0.000000e+00 : f32
    %6 = vector.broadcast %cst_5 : f32 to vector<8x128xf32>
    %7 = arith.maximumf %5, %6 : vector<8x128xf32>
    %c0_6 = arith.constant 0 : index
    %c0_7 = arith.constant 0 : index
    %8 = vector.load %arg3[%c0_6, %c0_7] : memref<128x512xf32, #tpu.memory_space<vmem>>, vector<128x128xf32>
    %cst_8 = arith.constant dense<0.000000e+00> : vector<8x128xf32>
    %9 = tpu.matmul %7, %8, %cst_8 {dimension_numbers = #tpu.dot_dimension_numbers<[1], [0], [0], [1], [0, 0, 1, 1], [], []>} : vector<8x128xf32>, vector<128x128xf32>, vector<8x128xf32> -> vector<8x128xf32>
    %c0_9 = arith.constant 0 : index
    %c128 = arith.constant 128 : index
    %10 = vector.load %arg4[%c0_9, %c128] : memref<1x640xf32, #tpu.memory_space<vmem>>, vector<1x128xf32>
    %11 = vector.broadcast %10 : vector<1x128xf32> to vector<8x128xf32>
    %12 = arith.addf %9, %11 : vector<8x128xf32>
    %cst_10 = arith.constant 0.000000e+00 : f32
    %13 = vector.broadcast %cst_10 : f32 to vector<8x128xf32>
    %14 = arith.maximumf %12, %13 : vector<8x128xf32>
    %c0_11 = arith.constant 0 : index
    %c128_12 = arith.constant 128 : index
    %15 = vector.load %arg3[%c0_11, %c128_12] : memref<128x512xf32, #tpu.memory_space<vmem>>, vector<128x128xf32>
    %cst_13 = arith.constant dense<0.000000e+00> : vector<8x128xf32>
    %16 = tpu.matmul %14, %15, %cst_13 {dimension_numbers = #tpu.dot_dimension_numbers<[1], [0], [0], [1], [0, 0, 1, 1], [], []>} : vector<8x128xf32>, vector<128x128xf32>, vector<8x128xf32> -> vector<8x128xf32>
    %c0_14 = arith.constant 0 : index
    %c256 = arith.constant 256 : index
    %17 = vector.load %arg4[%c0_14, %c256] : memref<1x640xf32, #tpu.memory_space<vmem>>, vector<1x128xf32>
    %18 = vector.broadcast %17 : vector<1x128xf32> to vector<8x128xf32>
    %19 = arith.addf %16, %18 : vector<8x128xf32>
    %cst_15 = arith.constant 0.000000e+00 : f32
    %20 = vector.broadcast %cst_15 : f32 to vector<8x128xf32>
    %21 = arith.maximumf %19, %20 : vector<8x128xf32>
    %c0_16 = arith.constant 0 : index
    %c256_17 = arith.constant 256 : index
    %22 = vector.load %arg3[%c0_16, %c256_17] : memref<128x512xf32, #tpu.memory_space<vmem>>, vector<128x256xf32>
    %cst_18 = arith.constant dense<0.000000e+00> : vector<8x256xf32>
    %23 = tpu.matmul %21, %22, %cst_18 {dimension_numbers = #tpu.dot_dimension_numbers<[1], [0], [0], [1], [0, 0, 1, 1], [], []>} : vector<8x128xf32>, vector<128x256xf32>, vector<8x256xf32> -> vector<8x256xf32>
    %c0_19 = arith.constant 0 : index
    %c384 = arith.constant 384 : index
    %24 = vector.load %arg4[%c0_19, %c384] : memref<1x640xf32, #tpu.memory_space<vmem>>, vector<1x256xf32>
    %25 = vector.broadcast %24 : vector<1x256xf32> to vector<8x256xf32>
    %26 = arith.addf %23, %25 : vector<8x256xf32>
    %27 = vector.extract_strided_slice %26 {offsets = [0, 0], sizes = [8, 128], strides = [1, 1]} : vector<8x256xf32> to vector<8x128xf32>
    %28 = vector.extract_strided_slice %26 {offsets = [0, 128], sizes = [8, 128], strides = [1, 1]} : vector<8x256xf32> to vector<8x128xf32>
    %c64_i32 = arith.constant 64 : i32
    %29 = tpu.dynamic_rotate %27 by %c64_i32 dim 1 : vector<8x128xf32>, i32 -> vector<8x128xf32>
    %30 = arith.addf %29, %28 : vector<8x128xf32>
    %cst_20 = arith.constant 5.000000e-01 : f32
    %31 = vector.broadcast %cst_20 : f32 to vector<8x128xf32>
    %32 = arith.mulf %31, %30 : vector<8x128xf32>
    %33 = arith.addf %27, %29 : vector<8x128xf32>
    %34 = arith.subf %33, %32 : vector<8x128xf32>
    %35 = arith.addf %27, %28 : vector<8x128xf32>
    %36 = arith.subf %35, %32 : vector<8x128xf32>
    %37 = tpu.iota {dimensions = array<i32: 1>} : vector<8x128xi32>
    %c50_i32 = arith.constant 50 : i32
    %38 = vector.broadcast %c50_i32 : i32 to vector<8x128xi32>
    %39 = arith.cmpi slt, %37, %38 : vector<8x128xi32>
    %cst_21 = arith.constant -1.000000e+30 : f32
    %40 = vector.broadcast %cst_21 : f32 to vector<8x128xf32>
    %41 = arith.select %39, %34, %40 : vector<8x128xi1>, vector<8x128xf32>
    %cst_22 = arith.constant dense<0xFF800000> : vector<8xf32>
    %42 = vector.multi_reduction <maximumf>, %41, %cst_22 [1] : vector<8x128xf32> to vector<8xf32>
    %43 = vector.shape_cast %42 : vector<8xf32> to vector<8x1xf32>
    %44 = vector.broadcast %43 : vector<8x1xf32> to vector<8x128xf32>
    %45 = arith.subf %41, %44 : vector<8x128xf32>
    %46 = math.exp %45 : vector<8x128xf32>
    %cst_23 = arith.constant 0.000000e+00 : f32
    %47 = vector.broadcast %cst_23 : f32 to vector<8x128xf32>
    %48 = arith.select %39, %46, %47 : vector<8x128xi1>, vector<8x128xf32>
    %cst_24 = arith.constant dense<0.000000e+00> : vector<8xf32>
    %49 = vector.multi_reduction <add>, %48, %cst_24 [1] : vector<8x128xf32> to vector<8xf32>
    %50 = vector.shape_cast %49 : vector<8xf32> to vector<8x1xf32>
    %51 = tpu.reciprocal %50 {approx = true} : vector<8x1xf32> -> vector<8x1xf32>
    %52 = arith.mulf %50, %51 : vector<8x1xf32>
    %cst_25 = arith.constant 2.000000e+00 : f32
    %53 = vector.broadcast %cst_25 : f32 to vector<8x1xf32>
    %54 = arith.subf %53, %52 : vector<8x1xf32>
    %55 = arith.mulf %51, %54 : vector<8x1xf32>
    %56 = vector.broadcast %55 : vector<8x1xf32> to vector<8x128xf32>
    %57 = arith.mulf %48, %56 : vector<8x128xf32>
    %cst_26 = arith.constant -1.000000e+30 : f32
    %58 = vector.broadcast %cst_26 : f32 to vector<8x128xf32>
    %59 = arith.select %39, %36, %58 : vector<8x128xi1>, vector<8x128xf32>
    %cst_27 = arith.constant dense<0xFF800000> : vector<8xf32>
    %60 = vector.multi_reduction <maximumf>, %59, %cst_27 [1] : vector<8x128xf32> to vector<8xf32>
    %61 = vector.shape_cast %60 : vector<8xf32> to vector<8x1xf32>
    %62 = vector.broadcast %61 : vector<8x1xf32> to vector<8x128xf32>
    %63 = arith.subf %59, %62 : vector<8x128xf32>
    %64 = math.exp %63 : vector<8x128xf32>
    %cst_28 = arith.constant 0.000000e+00 : f32
    %65 = vector.broadcast %cst_28 : f32 to vector<8x128xf32>
    %66 = arith.select %39, %64, %65 : vector<8x128xi1>, vector<8x128xf32>
    %cst_29 = arith.constant dense<0.000000e+00> : vector<8xf32>
    %67 = vector.multi_reduction <add>, %66, %cst_29 [1] : vector<8x128xf32> to vector<8xf32>
    %68 = vector.shape_cast %67 : vector<8xf32> to vector<8x1xf32>
    %69 = tpu.reciprocal %68 {approx = true} : vector<8x1xf32> -> vector<8x1xf32>
    %70 = arith.mulf %68, %69 : vector<8x1xf32>
    %cst_30 = arith.constant 2.000000e+00 : f32
    %71 = vector.broadcast %cst_30 : f32 to vector<8x1xf32>
    %72 = arith.subf %71, %70 : vector<8x1xf32>
    %73 = arith.mulf %69, %72 : vector<8x1xf32>
    %74 = vector.broadcast %73 : vector<8x1xf32> to vector<8x128xf32>
    %75 = arith.mulf %66, %74 : vector<8x128xf32>
    %c64_i32_31 = arith.constant 64 : i32
    %76 = tpu.dynamic_rotate %75 by %c64_i32_31 dim 1 : vector<8x128xf32>, i32 -> vector<8x128xf32>
    %77 = arith.addf %57, %76 : vector<8x128xf32>
    %c0_32 = arith.constant 0 : index
    %c0_33 = arith.constant 0 : index
    %78 = vector.load %arg5[%c0_32, %c0_33] : memref<8x128xf32, #tpu.memory_space<vmem>>, vector<8x128xf32>
    tpu.vector_store %arg5[%c0_32, %c0_33], %77 {strides = array<i32>} : memref<8x128xf32, #tpu.memory_space<vmem>>, vector<8x128xf32>,
    return
  }
  func.func @transform_0(%arg0: i32) -> (i32, i32) {
    %c0_i32 = arith.constant 0 : i32
    %c0_i32_0 = arith.constant 0 : i32
    return %arg0, %c0_i32 : i32, i32
  }
  func.func @transform_1(%arg0: i32) -> (i32, i32) {
    %c0_i32 = arith.constant 0 : i32
    %c0_i32_0 = arith.constant 0 : i32
    %c0_i32_1 = arith.constant 0 : i32
    return %c0_i32, %c0_i32_0 : i32, i32
  }
  func.func @transform_2(%arg0: i32) -> (i32, i32) {
    %c0_i32 = arith.constant 0 : i32
    %c0_i32_0 = arith.constant 0 : i32
    %c0_i32_1 = arith.constant 0 : i32
    return %c0_i32, %c0_i32_0 : i32, i32
  }
  func.func @transform_3(%arg0: i32) -> (i32, i32) {
    %c0_i32 = arith.constant 0 : i32
    %c0_i32_0 = arith.constant 0 : i32
    %c0_i32_1 = arith.constant 0 : i32
    return %c0_i32, %c0_i32_0 : i32, i32
  }
  func.func @transform_4(%arg0: i32) -> (i32, i32) {
    %c0_i32 = arith.constant 0 : i32
    %c0_i32_0 = arith.constant 0 : i32
    return %arg0, %c0_i32 : i32, i32
  }
}

</mosaic_0001>

<bundles_post_ra>
// kernel: tpu_custom_call.1
= control target key start
LH: loop header
LB: loop body
LE: loop exit
PB: predicated region body
PF: predicated region fallthrough
CT: control target
= control target key end

     0   :  { %9 = vsyncpa [#allocation3], 0  ;;  %s933_s0 = inlined_call_operand.hbm [shape: f32[8,8], index: 0, kind: input, shape index: {}]   ;;  %s934_s1 = inlined_call_operand.hbm [shape: f32[8,128], index: 1, kind: input, shape index: {}]   ;;  %s935_s2 = inlined_call_operand.hbm [shape: f32[128,512], index: 2, kind: input, shape index: {}]   ;;  %s936_s3 = inlined_call_operand.vmem [shape: f32[1,640], index: 3, kind: input, shape index: {}]   ;;  %s937_s4 = inlined_call_operand.hbm [shape: f32[8,128], index: 4, kind: output, shape index: {}]  }
   0x1   :  { %10 = vsyncpa [#allocation6], 0 }
   0x2   :  { %11 = vsyncpa [#allocation4], 0  ;;  %s808_s15 = smov [#allocation5]   ;;  %s809_s17 = smov [#allocation2]  }
   0x3   :  { %s28_s16 = sshll.u32 %s808_s15, 4  ;;  %s18_s18 = sshll.u32 %s809_s17, 4  ;;  %s29_s16 = int_to_ptr.vmem [resolvable:$true] %s28_s16  ;;  %s19_s18 = int_to_ptr.vmem [resolvable:$true] %s18_s18 }
   0x4   :  { %s714_s21 = scalar_lea.hbm %s934_s1, 128 }
   0x5   :  { %p715_p0 = scmp.ne.s32.totalorder %s934_s1, %s714_s21  ;;  %p718_p1 = scmp.lt.u32.totalorder %s714_s21, %s934_s1 }
   0x7   :  { %p720_p2 = pnand %p718_p1, %p715_p0 }
   0x9   :  { %723 = shalt.err (!%p720_p2)
}
   0xa   :  { %s724_s26 = scalar_lea.vmem %s29_s16, 128  ;;  %p729_p4 = scmp.lt.s32.totalorder %s29_s16, %s29_s16 }
   0xb   :  { %p725_p3 = scmp.ne.s32.totalorder %s29_s16, %s724_s26  ;;  %p730_p5 = scmp.lt.s32.totalorder %s724_s26, %s724_s26 }
   0xd   :  { %p731_p6 = por %p730_p5, %p729_p4 }
   0xf   :  { %p732_p7 = pnand %p731_p6, %p725_p3 }
  0x11   :  { %735 = shalt.err (!%p732_p7)
}
  0x12   :  { %31 = dma.hbm_to_vmem [thread:$0]  %s934_s1, 128, %s29_s16, [#allocation6]  }
  0x13   :  { %s736_s5 = scalar_lea.hbm %s933_s0, 128 }
  0x14   :  { %p737_p8 = scmp.ne.s32.totalorder %s933_s0, %s736_s5  ;;  %p740_p9 = scmp.lt.u32.totalorder %s736_s5, %s933_s0 }
  0x16   :  { %p742_p10 = pnand %p740_p9, %p737_p8 }
  0x18   :  { %745 = shalt.err (!%p742_p10)
}
  0x19   :  { %s746_s10 = scalar_lea.vmem %s19_s18, 128  ;;  %p751_p12 = scmp.lt.s32.totalorder %s19_s18, %s19_s18 }
  0x1a   :  { %p747_p11 = scmp.ne.s32.totalorder %s19_s18, %s746_s10  ;;  %p752_p13 = scmp.lt.s32.totalorder %s746_s10, %s746_s10 }
  0x1c   :  { %p753_p0 = por %p752_p13, %p751_p12 }
  0x1e   :  { %p754_p1 = pnand %p753_p0, %p747_p11 }
  0x20   :  { %757 = shalt.err (!%p754_p1)
}
  0x21   :  { %21 = dma.hbm_to_vmem [thread:$0]  %s933_s0, 128, %s19_s18, [#allocation3]  }
  0x22   :  { %s810_s12 = smov [#allocation7]   ;;  %s758_s16 = scalar_lea.hbm %s935_s2, 8192 }
  0x23   :  { %s37_s13 = sshll.u32 %s810_s12, 4  ;;  %p759_p2 = scmp.ne.s32.totalorder %s935_s2, %s758_s16  ;;  %s38_s13 = int_to_ptr.vmem [resolvable:$true] %s37_s13 }
  0x24   :  { %p762_p3 = scmp.lt.u32.totalorder %s758_s16, %s935_s2 }
  0x26   :  { %p764_p4 = pnand %p762_p3, %p759_p2 }
  0x28   :  { %767 = shalt.err (!%p764_p4)
}
  0x29   :  { %s768_s22 = scalar_lea.vmem %s38_s13, 8192  ;;  %p773_p6 = scmp.lt.s32.totalorder %s38_s13, %s38_s13 }
  0x2a   :  { %p769_p5 = scmp.ne.s32.totalorder %s38_s13, %s768_s22  ;;  %p774_p7 = scmp.lt.s32.totalorder %s768_s22, %s768_s22 }
  0x2c   :  { %p775_p8 = por %p774_p7, %p773_p6 }
  0x2e   :  { %p776_p9 = pnand %p775_p8, %p769_p5 }
  0x30   :  { %779 = shalt.err (!%p776_p9)
}
  0x31   :  { %s811_s0 = smov 512   ;;  %s812_s18 = smov 32  }
  0x32   :  { %43 = dma.hbm_to_vmem [thread:$0]  %s935_s2, 8192, %s38_s13, [#allocation6], %s811_s0, %s811_s0, %s812_s18  }
  0x33   :  { %802 = dma.done.wait [#allocation3], 128  }
  0x34   :  { %803 = vsyncadd [#allocation3], 4294967168 }
  0x35   :  { %804 = dma.done.wait [#allocation6], 8320  }
  0x36   :  { %805 = vsyncadd [#allocation6], 4294958976  ;;  %v813_v0 = vmov 0.0   ;;  %vm814_vm0 = vmmov 0   ;;  %v815_v1 = vmov 0.0|0.0   ;;  %vm64_vm1 = vcmask 64512  }
  0x37   :  { %541 = vmatprep.subr.mxu0 %v813_v0  ;;  %543 = vmatprep.mubr.msk.f32.mxu0 %vm814_vm0, %v813_v0  ;;  %v56_v2 = vld [vmem:[#allocation5] sm:$0xff]  ;;  %v55_v3 = vld [vmem:[#allocation2] sm:$0xff]  ;;  %v139_v4 = vld [vmem:[#allocation7] sm:$0xff]  ;;  %s816_s6 = smov 64  }
  0x38   :  { %616 = vmatprep.subr.bf16.mxu1 %v815_v1  ;;  %578 = vmatprep.mubr.msk.f32.mxu1 %vm814_vm0, %v813_v0  ;;  %v140_v5 = vld [vmem:[#allocation7 + $0x20] sm:$0xff]  ;;  %v233_v28 = vld [vmem:[#allocation7 + $0x8] sm:$0xff]  ;;  %v501_v49 = vld [vmem:[%s936_s3] ss:$0 sm:$0xff] }
  0x39   :  { %542 = vmatpush3.msra.mxu0 %v56_v2  ;;  %v141_v6 = vld [vmem:[#allocation7 + $0x40] sm:$0xff]  ;;  %v617_v8 = vpack.c.bf16 %v140_v5, %v139_v4  ;;  %v234_v29 = vld [vmem:[#allocation7 + $0x28] sm:$0xff]  ;;  %v328_v57 = vld [vmem:[#allocation7 + $0x18] sm:$0xff] }
  0x3a   :  { %v142_v7 = vld [vmem:[#allocation7 + $0x60] sm:$0xff]  ;;  %544 = vmatmul.mubr.msk.f32.vlgmr.msra.gmra.mrb[0].mxu0 %vm64_vm1, %v55_v3  ;;  %640 = vmatprep.subr.bf16.mxu0 %v815_v1  ;;  %v235_v30 = vld [vmem:[#allocation7 + $0x48] sm:$0xff]  ;;  %v641_v31 = vpack.c.bf16 %v234_v29, %v233_v28  ;;  %v330_v58 = vld [vmem:[#allocation7 + $0x38] sm:$0xff] }
  0x3b   :  { %613 = vmatprep.mubr.msk.f32.mxu0 %vm814_vm0, %v813_v0  ;;  %618 = vmatpush3.bf16.msra.mxu1 %v617_v8  ;;  %v620_v9 = vpack.c.bf16 %v142_v7, %v141_v6  ;;  %v143_v10 = vld [vmem:[#allocation7 + $0x80] sm:$0xff]  ;;  %v236_v32 = vld [vmem:[#allocation7 + $0x68] sm:$0xff]  ;;  %v327_v59 = vld [vmem:[#allocation7 + $0x10] sm:$0xff]  ;;  %v664_v60 = vpack.c.bf16 %v330_v58, %v328_v57 }
  0x3c   :  { %619 = vmatprep.subr.bf16.mxu1 %v815_v1  ;;  %v144_v11 = vld [vmem:[#allocation7 + $0xa0] sm:$0xff]  ;;  %642 = vmatpush3.bf16.msra.mxu0 %v641_v31  ;;  %v644_v33 = vpack.c.bf16 %v236_v32, %v235_v30  ;;  %v237_v34 = vld [vmem:[#allocation7 + $0x88] sm:$0xff]  ;;  %v329_v61 = vld [vmem:[#allocation7 + $0x30] sm:$0xff] }
  0x3d   :  { %v623_v12 = vpack.c.bf16 %v144_v11, %v143_v10  ;;  %v145_v13 = vld [vmem:[#allocation7 + $0xc0] sm:$0xff]  ;;  %643 = vmatprep.subr.bf16.mxu0 %v815_v1  ;;  %v238_v35 = vld [vmem:[#allocation7 + $0xa8] sm:$0xff]  ;;  %v332_v62 = vld [vmem:[#allocation7 + $0x58] sm:$0xff] }
  0x3e   :  { %v146_v14 = vld [vmem:[#allocation7 + $0xe0] sm:$0xff]  ;;  %v647_v36 = vpack.c.bf16 %v238_v35, %v237_v34  ;;  %v239_v37 = vld [vmem:[#allocation7 + $0xc8] sm:$0xff]  ;;  %v334_v63 = vld [vmem:[#allocation7 + $0x78] sm:$0xff] }
  0x3f   :  { %621 = vmatpush3.bf16.msra.mxu1 %v620_v9  ;;  %v626_v15 = vpack.c.bf16 %v146_v14, %v145_v13  ;;  %v147_v16 = vld [vmem:[#allocation7 + $0x100] sm:$0xff]  ;;  %v240_v38 = vld [vmem:[#allocation7 + $0xe8] sm:$0xff]  ;;  %v668_v2 = vpack.c.bf16 %v334_v63, %v332_v62  ;;  %v331_v3 = vld [vmem:[#allocation7 + $0x50] sm:$0xff] }
  0x40   :  { %622 = vmatprep.subr.bf16.mxu1 %v815_v1  ;;  %v148_v17 = vld [vmem:[#allocation7 + $0x120] sm:$0xff]  ;;  %645 = vmatpush3.bf16.msra.mxu0 %v644_v33  ;;  %v650_v39 = vpack.c.bf16 %v240_v38, %v239_v37  ;;  %v241_v40 = vld [vmem:[#allocation7 + $0x108] sm:$0xff]  ;;  %v333_v4 = vld [vmem:[#allocation7 + $0x70] sm:$0xff] }
  0x41   :  { %v629_v18 = vpack.c.bf16 %v148_v17, %v147_v16  ;;  %v149_v19 = vld [vmem:[#allocation7 + $0x140] sm:$0xff]  ;;  %646 = vmatprep.subr.bf16.mxu0 %v815_v1  ;;  %v242_v41 = vld [vmem:[#allocation7 + $0x128] sm:$0xff]  ;;  %v336_v5 = vld [vmem:[#allocation7 + $0x98] sm:$0xff] }
  0x42   :  { %v150_v20 = vld [vmem:[#allocation7 + $0x160] sm:$0xff]  ;;  %v653_v42 = vpack.c.bf16 %v242_v41, %v241_v40  ;;  %v243_v43 = vld [vmem:[#allocation7 + $0x148] sm:$0xff]  ;;  %v338_v6 = vld [vmem:[#allocation7 + $0xb8] sm:$0xff] }
  0x43   :  { %624 = vmatpush3.bf16.msra.mxu1 %v623_v12  ;;  %v632_v21 = vpack.c.bf16 %v150_v20, %v149_v19  ;;  %v151_v22 = vld [vmem:[#allocation7 + $0x180] sm:$0xff]  ;;  %v244_v44 = vld [vmem:[#allocation7 + $0x168] sm:$0xff]  ;;  %v672_v7 = vpack.c.bf16 %v338_v6, %v336_v5  ;;  %v335_v8 = vld [vmem:[#allocation7 + $0x90] sm:$0xff] }
  0x44   :  { %625 = vmatprep.subr.bf16.mxu1 %v815_v1  ;;  %v152_v23 = vld [vmem:[#allocation7 + $0x1a0] sm:$0xff]  ;;  %648 = vmatpush3.bf16.msra.mxu0 %v647_v36  ;;  %v656_v45 = vpack.c.bf16 %v244_v44, %v243_v43  ;;  %v245_v46 = vld [vmem:[#allocation7 + $0x188] sm:$0xff]  ;;  %v337_v9 = vld [vmem:[#allocation7 + $0xb0] sm:$0xff] }
  0x45   :  { %v635_v24 = vpack.c.bf16 %v152_v23, %v151_v22  ;;  %v153_v25 = vld [vmem:[#allocation7 + $0x1c0] sm:$0xff]  ;;  %649 = vmatprep.subr.bf16.mxu0 %v815_v1  ;;  %v246_v47 = vld [vmem:[#allocation7 + $0x1a8] sm:$0xff]  ;;  %v340_v10 = vld [vmem:[#allocation7 + $0xd8] sm:$0xff]  ;;  %v674_v12 = vpack.c.bf16 %v337_v9, %v335_v8 }
  0x46   :  { %v154_v26 = vld [vmem:[#allocation7 + $0x1e0] sm:$0xff]  ;;  %v659_v48 = vpack.c.bf16 %v246_v47, %v245_v46  ;;  %v247_v54 = vld [vmem:[#allocation7 + $0x1c8] sm:$0xff]  ;;  %v342_v11 = vld [vmem:[#allocation7 + $0xf8] sm:$0xff] }
  0x47   :  { %627 = vmatpush3.bf16.msra.mxu1 %v626_v15  ;;  %v638_v27 = vpack.c.bf16 %v154_v26, %v153_v25  ;;  %v248_v55 = vld [vmem:[#allocation7 + $0x1e8] sm:$0xff]  ;;  %v676_v13 = vpack.c.bf16 %v342_v11, %v340_v10  ;;  %v339_v14 = vld [vmem:[#allocation7 + $0xd0] sm:$0xff]  ;;  %v344_v16 = vld [vmem:[#allocation7 + $0x118] sm:$0xff] }
  0x48   :  { %628 = vmatprep.subr.bf16.mxu1 %v815_v1  ;;  %651 = vmatpush3.bf16.msra.mxu0 %v650_v39  ;;  %v662_v56 = vpack.c.bf16 %v248_v55, %v247_v54  ;;  %v341_v15 = vld [vmem:[#allocation7 + $0xf0] sm:$0xff]  ;;  %v346_v17 = vld [vmem:[#allocation7 + $0x138] sm:$0xff] }
  0x49   :  { %652 = vmatprep.subr.bf16.mxu0 %v815_v1  ;;  %v680_v19 = vpack.c.bf16 %v346_v17, %v344_v16  ;;  %v343_v20 = vld [vmem:[#allocation7 + $0x110] sm:$0xff]  ;;  %v348_v22 = vld [vmem:[#allocation7 + $0x158] sm:$0xff] }
  0x4a   :  { %v350_v23 = vld [vmem:[#allocation7 + $0x178] sm:$0xff]  ;;  %v347_v26 = vld [vmem:[#allocation7 + $0x150] sm:$0xff] }
  0x4b   :  { %630 = vmatpush3.bf16.msra.mxu1 %v629_v18  ;;  %v678_v18 = vpack.c.bf16 %v341_v15, %v339_v14  ;;  %v684_v25 = vpack.c.bf16 %v350_v23, %v348_v22  ;;  %v352_v28 = vld [vmem:[#allocation7 + $0x198] sm:$0xff]  ;;  %v351_v32 = vld [vmem:[#allocation7 + $0x190] sm:$0xff] }
  0x4c   :  { %631 = vmatprep.subr.bf16.mxu1 %v815_v1  ;;  %654 = vmatpush3.bf16.msra.mxu0 %v653_v42  ;;  %v354_v29 = vld [vmem:[#allocation7 + $0x1b8] sm:$0xff]  ;;  %v353_v33 = vld [vmem:[#allocation7 + $0x1b0] sm:$0xff] }
  0x4d   :  { %655 = vmatprep.subr.bf16.mxu0 %v815_v1  ;;  %v688_v31 = vpack.c.bf16 %v354_v29, %v352_v28  ;;  %v690_v34 = vpack.c.bf16 %v353_v33, %v351_v32  ;;  %v503_v35 = vld [vmem:[%s936_s3 + $0x1] ss:$0 sm:$0xff]  ;;  %v356_v40 = vld [vmem:[#allocation7 + $0x1d8] sm:$0xff]  ;;  %v504_v46 = vld [vmem:[%s936_s3 + $0x2] ss:$0 sm:$0xff] }
  0x4e   :  { %v358_v41 = vld [vmem:[#allocation7 + $0x1f8] sm:$0xff]  ;;  %v355_v43 = vld [vmem:[#allocation7 + $0x1d0] sm:$0xff] }
  0x4f   :  { %633 = vmatpush3.bf16.msra.mxu1 %v632_v21  ;;  %v345_v21 = vld [vmem:[#allocation7 + $0x130] sm:$0xff]  ;;  %v692_v42 = vpack.c.bf16 %v358_v41, %v356_v40 }
  0x50   :  { %634 = vmatprep.subr.bf16.mxu1 %v815_v1  ;;  %657 = vmatpush3.bf16.msra.mxu0 %v656_v45  ;;  %v357_v44 = vld [vmem:[#allocation7 + $0x1f0] sm:$0xff] }
  0x51   :  { %658 = vmatprep.subr.bf16.mxu0 %v815_v1  ;;  %v694_v45 = vpack.c.bf16 %v357_v44, %v355_v43  ;;  %v359_v54 = vld [vmem:[%s936_s3 + $0x3] sm:$0x3]  ;;  %s817_s3 = smov [#allocation8]  }
  0x52   :  { %s491_s7 = sshll.u32 %s817_s3, 4  ;;  %s492_s7 = int_to_ptr.vmem [resolvable:$true] %s491_s7 }
  0x53   :  { %636 = vmatpush3.bf16.msra.mxu1 %v635_v24  ;;  %v682_v24 = vpack.c.bf16 %v345_v21, %v343_v20  ;;  %s780_s8 = scalar_lea.vmem %s492_s7, 128  ;;  %p785_p11 = scmp.lt.s32.totalorder %s492_s7, %s492_s7 }
  0x54   :  { %637 = vmatprep.subr.bf16.mxu1 %v815_v1  ;;  %660 = vmatpush3.bf16.msra.mxu0 %v659_v48  ;;  %p781_p10 = scmp.ne.s32.totalorder %s492_s7, %s780_s8  ;;  %p786_p12 = scmp.lt.s32.totalorder %s780_s8, %s780_s8 }
  0x55   :  { %661 = vmatprep.subr.bf16.mxu0 %v815_v1  ;;  %v666_v1 = vpack.c.bf16 %v329_v61, %v327_v59 }
  0x56   :  { %p787_p13 = por %p786_p12, %p785_p11 }
  0x57   :  { %639 = vmatpush3.bf16.msra.mxu1 %v638_v27  ;;  %v349_v27 = vld [vmem:[#allocation7 + $0x170] sm:$0xff] }
  0x58   :  { %663 = vmatpush3.bf16.msra.mxu0 %v662_v56  ;;  %665 = vmatprep.subr.bf16.mxu1 %v664_v60  ;;  %v686_v30 = vpack.c.bf16 %v349_v27, %v347_v26  ;;  %p788_p0 = pnand %p787_p13, %p781_p10 }
 0x10d   :  { %v134_v50 = vpop.f32.mrb[0].mxu0 }
 0x10e   :  { %v135_v51 = vadd.f32 %v501_v49, %v134_v50  ;;  %v545_v52 = vpop.f32.mrb[1].mxu0 }
 0x110   :  { %v138_v53 = vmax.f32 %v135_v51, 0.0  ;;  %v361_v51 = vlaneseq }
 0x112   :  { %579 = vmatmul.mubr.f32.vlgmr.msra.gmra.mrb[0].mxu1 %v138_v53  ;;  %v362_v52 = vshrl.u32 %v361_v51, 7  ;;  %v451_v63 = vand.u32 127, %v361_v51 }
 0x113   :  { %435 = vmatprep.mubr.f32.mxu1 %v813_v0  ;;  %667 = vmatpush1.bf16.msra.mxu1 %v666_v1  ;;  %v670_v0 = vpack.c.bf16 %v333_v4, %v331_v3 }
 0x114   :  { %669 = vmatprep.subr.bf16.mxu1 %v668_v2  ;;  %v363_v53 = vsub.s32 0, %v362_v52  ;;  %v367_v59 = vsub.s32 1, %v362_v52  ;;  %vm452_vm2 = vcmp.lt.s32.totalorder %v451_v63, 50 }
 0x116   :  { %v364_v55 = vrot.slane %v359_v54, %v363_v53  ;;  %v368_v60 = vrot.slane %v359_v54, %v367_v59 }
 0x117   :  { %671 = vmatpush1.bf16.msra.mxu1 %v670_v0 }
 0x118   :  { %673 = vmatprep.subr.bf16.mxu1 %v672_v7 }
 0x11b   :  { %675 = vmatpush1.bf16.msra.mxu1 %v674_v12 }
 0x11c   :  { %677 = vmatprep.subr.bf16.mxu1 %v676_v13 }
 0x11f   :  { %679 = vmatpush1.bf16.msra.mxu1 %v678_v18 }
 0x120   :  { %681 = vmatprep.subr.bf16.mxu1 %v680_v19 }
 0x123   :  { %683 = vmatpush1.bf16.msra.mxu1 %v682_v24 }
 0x124   :  { %685 = vmatprep.subr.bf16.mxu1 %v684_v25 }
 0x127   :  { %687 = vmatpush1.bf16.msra.mxu1 %v686_v30 }
 0x128   :  { %689 = vmatprep.subr.bf16.mxu1 %v688_v31 }
 0x12b   :  { %691 = vmatpush1.bf16.msra.mxu1 %v690_v34 }
 0x12c   :  { %693 = vmatprep.subr.bf16.mxu1 %v692_v42 }
 0x12f   :  { %695 = vmatpush1.bf16.msra.mxu1 %v694_v45 }
 0x1e5   :  { %v228_v36 = vpop.f32.mrb[0].mxu1 }
 0x1e6   :  { %v229_v37 = vadd.f32 %v503_v35, %v228_v36  ;;  %v580_v38 = vpop.f32.mrb[1].mxu1 }
 0x1e8   :  { %v232_v39 = vmax.f32 %v229_v37, 0.0 }
 0x1ea   :  { %614 = vmatmul.mubr.f32.vlgmr.msra.gmra.mrb[2].mxu0 %v232_v39 }
 0x2bd   :  { %v322_v47 = vpop.f32.mrb[2].mxu0 }
 0x2be   :  { %v323_v48 = vadd.f32 %v504_v46, %v322_v47  ;;  %v615_v49 = vpop.f32.mrb[3].mxu0 }
 0x2c0   :  { %v326_v50 = vmax.f32 %v323_v48, 0.0 }
 0x2c2   :  { %436 = vmatmul.mubr.f32.vlgmr.msra.gmra.mrb[2].mxu1 %v326_v50 }
 0x395   :  { %v437_v56 = vpop.f32.mrb[2].mxu1 }
 0x396   :  { %v438_v57 = vadd.f32 %v437_v56, %v364_v55  ;;  %v439_v58 = vpop.f32.mrb[3].mxu1 }
 0x397   :  { %v440_v61 = vadd.f32 %v439_v58, %v368_v60 }
 0x398   :  { %442 = vrot.lane.b32.xlu0 %v438_v57, %s816_s6 }
 0x399   :  { %v448_v2 = vadd.f32 %v440_v61, %v438_v57 }
 0x40a   :  { %v443_v62 = vpop.permute.xlu0 %442 }
 0x40b   :  { %v444_v1 = vadd.f32 %v443_v62, %v440_v61  ;;  %v446_v4 = vadd.f32 %v443_v62, %v438_v57 }
 0x40d   :  { %v445_v3 = vmul.f32 0.5, %v444_v1 }
 0x40f   :  { %v447_v5 = vsub.f32 %v446_v4, %v445_v3  ;;  %v449_v6 = vsub.f32 %v448_v2, %v445_v3 }
 0x411   :  { %v453_v0 = vsel %vm452_vm2, %v447_v5, -1e+30  ;;  %v467_v7 = vsel %vm452_vm2, %v449_v6, -1e+30 }
 0x412   :  { %454 = vmax.xlane.f32.xlu1 %v453_v0  ;;  %468 = vmax.xlane.f32.xlu0 %v467_v7 }
 0x49f   :  { %v455_v8 = vpop.xlane.xlu1 %454  ;;  %v469_v9 = vpop.xlane.xlu0 %468 }
 0x4a0   :  { %v456_v10 = vsub.f32 %v453_v0, %v455_v8  ;;  %v470_v11 = vsub.f32 %v467_v7, %v469_v9 }
 0x4a2   :  { %v471_v12 = vmul.f32 1.442695, %v470_v11  ;;  %v457_v13 = vmul.f32 1.442695, %v456_v10 }
 0x4a4   :  { %706 = vpow2.f32 %v471_v12 }
 0x4a5   :  { %708 = vpow2.f32 %v457_v13 }
 0x4ae   :  { %v707_v14 = vpop.eup %706 }
 0x4af   :  { %v473_v15 = vsel %vm452_vm2, %v707_v14, 0.0  ;;  %v709_v16 = vpop.eup %708 }
 0x4b0   :  { %474 = vadd.xlane.f32.xlu1 %v473_v15  ;;  %v459_v17 = vsel %vm452_vm2, %v709_v16, 0.0 }
 0x4b4   :  { %460 = vadd.xlane.f32.xlu1 %v459_v17 }
 0x53d   :  { %v475_v18 = vpop.xlane.xlu1 %474 }
 0x53e   :  { %710 = vrcp.f32 %v475_v18 }
 0x541   :  { %v461_v24 = vpop.xlane.xlu1 %460 }
 0x542   :  { %712 = vrcp.f32 %v461_v24 }
 0x548   :  { %v711_v19 = vpop.eup %710 }
 0x549   :  { %v477_v20 = vmul.f32 %v711_v19, %v475_v18 }
 0x54b   :  { %v478_v21 = vsub.f32 2.0, %v477_v20 }
 0x54c   :  { %v713_v25 = vpop.eup %712 }
 0x54d   :  { %v479_v22 = vmul.f32 %v711_v19, %v478_v21  ;;  %v463_v26 = vmul.f32 %v713_v25, %v461_v24 }
 0x54f   :  { %v480_v23 = vmul.f32 %v479_v22, %v473_v15  ;;  %v464_v27 = vsub.f32 2.0, %v463_v26 }
 0x551   :  { %481 = vrot.lane.b32.xlu1 %v480_v23, %s816_s6  ;;  %v465_v28 = vmul.f32 %v713_v25, %v464_v27 }
 0x553   :  { %v466_v29 = vmul.f32 %v465_v28, %v459_v17 }
 0x5c3   :  { %v482_v30 = vpop.permute.xlu1 %481 }
 0x5c4   :  { %v483_v31 = vadd.f32 %v482_v30, %v466_v29 }
 0x5c6   :  { %484 = vst [vmem:[#allocation8] sm:$0xff] %v483_v31 }
 0x5c7   :  { %791 = shalt.err (!%p788_p0)
}
 0x5c8   :  { %s792_s1 = scalar_lea.hbm %s937_s4, 128 }
 0x5c9   :  { %p793_p1 = scmp.ne.s32.totalorder %s937_s4, %s792_s1  ;;  %p796_p2 = scmp.lt.u32.totalorder %s792_s1, %s937_s4 }
 0x5cb   :  { %p798_p3 = pnand %p796_p2, %p793_p1 }
 0x5cd   :  { %801 = shalt.err (!%p798_p3)
}
 0x5ce   :  { %494 = dma.vmem_to_hbm [thread:$0]  %s492_s7, 128, %s937_s4, [#allocation4]  }
 0x5cf   :  { %806 = dma.done.wait [#allocation4], 128  }
 0x5d0   :  { %807 = vsyncadd [#allocation4], 4294967168 }
 0x5d1   :  { %498 = vsyncpa [#allocation3], 1 }
 0x5d2   :  { %499 = vsyncpa [#allocation6], 1 }
 0x5d3   :  { %500 = vsyncpa [#allocation4], 1 }

</bundles_post_ra>
